<compile_context>
chip_gen: v5e
topology: v5e:2x2
jax: 0.10.0
libtpu: 0.0.40
codegen_flags: <defaults>
</compile_context>

<pallas_src>
import functools

import jax
import jax.numpy as jnp
from jax import lax
from jax.experimental import pallas as pl
from jax.experimental.pallas import tpu as pltpu


def _round_up(x, m):
    return ((x + m - 1) // m) * m


def cnn_block_forward(x_nchw, conv_w, bn_gamma, bn_beta, *, conv_bias=None,
                      stride=2, eps=1e-5, tile_rows=512):
    """x_nchw: (N, Cin, H, W) f32. conv_w: (Cout, Cin, 4, 4). Returns NCHW f32.

    conv_bias is accepted for interface parity but unused: under train-mode
    BatchNorm a per-channel constant bias cancels exactly against the batch mean.
    (If this block is ever used to track running stats, the bias would matter.)
    """
    del conv_bias
    if stride != 2:
        # TODO(synk): only the module's default stride=2 (k=4, p=1) geometry is implemented.
        raise NotImplementedError("CNNBlock Pallas kernel supports stride=2 only")

    n, cin, h, w = x_nchw.shape
    cout = conv_w.shape[0]
    assert conv_w.shape == (cout, cin, 4, 4)
    assert h % 2 == 0 and w % 2 == 0, "H, W must be even for k=4, s=2, p=1"
    ho, wo = h // 2, w // 2

    k_full = 16 * cin                        # im2col contraction dim, order (kh, kw, ci)
    kp = _round_up(k_full, 128)              # lane-dense contraction
    cp = _round_up(cout, 128)                # lane-dense / MXU-friendly channel padding
    r_total = n * ho * wo                    # one matmul row per output pixel

    # ---- row tiling / grid geometry -----------------------------------------
    tile_rows = min(tile_rows, _round_up(r_total, 8))
    tile_rows = _round_up(tile_rows, 8)
    num_tiles = -(-r_total // tile_rows)
    p_stats = 2 if num_tiles >= 2 else 1     # v7x megacore split of the stats pass
    num_tiles = _round_up(num_tiles, p_stats)
    tiles_per_p = num_tiles // p_stats
    r_pad = num_tiles * tile_rows            # zero-padded rows contribute 0 to stats

    # ---- XLA-side layout prep (bf16 im2col) ----------------------------------
    # TODO(synk): for large Cin (k_full >= ~512) switch back to the space-to-depth
    # layout + in-kernel concat-K matmul to avoid the 4x im2col HBM expansion.
    xt = jnp.transpose(x_nchw.astype(jnp.bfloat16), (0, 2, 3, 1))      # NHWC bf16
    xp = jnp.pad(xt, ((0, 0), (1, 1), (1, 1), (0, 0)))                 # (N, H+2, W+2, Cin)
    cols = [xp[:, kh:kh + 2 * ho:2, kw:kw + 2 * wo:2, :]
            for kh in range(4) for kw in range(4)]                     # 16 x (N, Ho, Wo, Cin)
    xcol = jnp.stack(cols, axis=3).reshape(r_total, k_full)            # (R, 16*Cin)
    xcol = jnp.pad(xcol, ((0, r_pad - r_total), (0, kp - k_full)))     # (R_pad, Kp) bf16

    # Weight (Cout, Cin, 4, 4) -> (kh, kw, ci) x co, zero-padded, bf16.
    wk = jnp.transpose(conv_w, (2, 3, 1, 0)).reshape(k_full, cout)
    wk = jnp.pad(wk, ((0, kp - k_full), (0, cp - cout))).astype(jnp.bfloat16)

    gamma_p = jnp.pad(bn_gamma.astype(jnp.float32), (0, cp - cout)).reshape(1, cp)
    beta_p = jnp.pad(bn_beta.astype(jnp.float32), (0, cp - cout)).reshape(1, cp)

    # ---- kernels --------------------------------------------------------------
    def stats_kernel(x_ref, w_ref, sum_ref, sq_ref):
        # Per-partition, per-sublane partial sum / sum-of-squares of the conv,
        # accumulated directly into the VMEM-resident output blocks.
        @pl.when(pl.program_id(1) == 0)
        def _init():
            sum_ref[...] = jnp.zeros_like(sum_ref)
            sq_ref[...] = jnp.zeros_like(sq_ref)

        conv = jnp.dot(x_ref[...], w_ref[...],
                       preferred_element_type=jnp.float32)             # (tile_rows, Cp) f32
        c3 = conv.reshape(tile_rows // 8, 8, cp)
        sum_ref[...] += jnp.sum(c3, axis=0)
        sq_ref[...] += jnp.sum(c3 * c3, axis=0)

    def apply_kernel(x_ref, w_ref, scale_ref, shift_ref, o_ref):
        # Recompute conv tile, apply folded BN (scale/shift) + LeakyReLU(0.2).
        conv = jnp.dot(x_ref[...], w_ref[...],
                       preferred_element_type=jnp.float32)             # (tile_rows, Cp) f32
        y = conv * scale_ref[...] + shift_ref[...]
        o_ref[...] = jnp.maximum(y, 0.2 * y).astype(o_ref.dtype)

    matmul_flops = 2 * r_pad * kp * cp
    x_bytes = r_pad * kp * 2
    w_bytes = kp * cp * 2
    vmem_cap = 32 * 1024 * 1024              # safe on v5e/v6e/v7x; tiles are row-bounded

    # TODO(synk): pipeline_mode=pl.Buffered(1) on the constant-index weight /
    # scale / shift specs would halve their VMEM footprint for deep layers.
    sum_p, sq_p = pl.pallas_call(
        stats_kernel,
        out_shape=(jax.ShapeDtypeStruct((p_stats * 8, cp), jnp.float32),
                   jax.ShapeDtypeStruct((p_stats * 8, cp), jnp.float32)),
        grid=(p_stats, tiles_per_p),
        in_specs=[
            pl.BlockSpec((tile_rows, kp), lambda p, t: (p * tiles_per_p + t, 0)),
            pl.BlockSpec((kp, cp), lambda p, t: (0, 0)),
        ],
        out_specs=(pl.BlockSpec((8, cp), lambda p, t: (p, 0)),
                   pl.BlockSpec((8, cp), lambda p, t: (p, 0))),
        compiler_params=pltpu.CompilerParams(
            dimension_semantics=("parallel", "arbitrary"),
            vmem_limit_bytes=vmem_cap),
        cost_estimate=pl.CostEstimate(
            flops=matmul_flops, transcendentals=0,
            bytes_accessed=x_bytes + w_bytes + 2 * p_stats * 8 * cp * 4),
    )(xcol, wk)

    # Fold train-mode BatchNorm into one per-channel scale/shift (tiny XLA math).
    # NOTE: var = E[x^2] - mean^2 in f32; per-sublane/per-partition partials
    # reduce (but do not eliminate) cancellation risk at very large N*Ho*Wo.
    m_total = float(r_total)
    mean = jnp.sum(sum_p, axis=0, keepdims=True) / m_total              # (1, Cp)
    var = jnp.maximum(jnp.sum(sq_p, axis=0, keepdims=True) / m_total - mean * mean, 0.0)
    scale = gamma_p * lax.rsqrt(var + eps)
    shift = beta_p - mean * scale

    out_flat = pl.pallas_call(
        apply_kernel,
        out_shape=jax.ShapeDtypeStruct((r_pad, cp), jnp.float32),
        grid=(num_tiles,),
        in_specs=[
            pl.BlockSpec((tile_rows, kp), lambda i: (i, 0)),
            pl.BlockSpec((kp, cp), lambda i: (0, 0)),
            pl.BlockSpec((1, cp), lambda i: (0, 0)),
            pl.BlockSpec((1, cp), lambda i: (0, 0)),
        ],
        out_specs=pl.BlockSpec((tile_rows, cp), lambda i: (i, 0)),
        compiler_params=pltpu.CompilerParams(
            dimension_semantics=("parallel",),
            vmem_limit_bytes=vmem_cap),
        cost_estimate=pl.CostEstimate(
            flops=matmul_flops, transcendentals=0,
            bytes_accessed=x_bytes + w_bytes + r_pad * cp * 4),
    )(xcol, wk, scale, shift)

    # (R_pad, Cp) -> drop row/channel padding -> (N, Ho, Wo, Cout) -> NCHW f32.
    # TODO(synk): a fused pipeline of CNNBlocks should keep bf16 NHWC here and
    # skip this transpose; f32 NCHW is kept for parity with the PyTorch module.
    out = out_flat[:r_total, :cout].reshape(n, ho, wo, cout)
    return jnp.transpose(out, (0, 3, 1, 2))


def _reference(x_nchw, w_torch, b, gamma, beta, *, stride=2):
    # Full PyTorch-module semantics (incl. conv bias), f32.
    conv = lax.conv_general_dilated(
        x_nchw.astype(jnp.float32), w_torch.astype(jnp.float32),
        window_strides=(stride, stride), padding=((1, 1), (1, 1)),
        dimension_numbers=("NCHW", "OIHW", "NCHW"))
    conv = conv + b.reshape(1, -1, 1, 1)
    mean = jnp.mean(conv, axis=(0, 2, 3), keepdims=True)
    var = jnp.mean((conv - mean) ** 2, axis=(0, 2, 3), keepdims=True)
    xhat = (conv - mean) * lax.rsqrt(var + 1e-5)
    y = xhat * gamma.reshape(1, -1, 1, 1) + beta.reshape(1, -1, 1, 1)
    return jnp.where(y > 0, y, 0.2 * y)


if __name__ == "__main__":
    key = jax.random.PRNGKey(0)
    k_x, k_w, k_b = jax.random.split(key, 3)

    N, Cin, H, W = 2, 4, 16, 16
    Cout, stride = 8, 2

    x = jax.random.normal(k_x, (N, Cin, H, W), dtype=jnp.float32)
    w = 0.1 * jax.random.normal(k_w, (Cout, Cin, 4, 4), dtype=jnp.float32)
    b = 0.1 * jax.random.normal(k_b, (Cout,), dtype=jnp.float32)   # cancelled by train-mode BN
    gamma = jnp.ones((Cout,), dtype=jnp.float32)    # BatchNorm2d default weight
    beta = jnp.zeros((Cout,), dtype=jnp.float32)    # BatchNorm2d default bias

    fwd = jax.jit(functools.partial(cnn_block_forward, stride=stride))
    out = jax.block_until_ready(fwd(x, w, gamma, beta))

    ref = jax.block_until_ready(_reference(x, w, b, gamma, beta, stride=stride))
    assert out.shape == (N, Cout, H // 2, W // 2), out.shape
    err = float(jnp.max(jnp.abs(out - ref)))
    # Tolerance sized for bf16 MXU inputs (f32 accumulation) vs f32 reference.
    assert jnp.allclose(out, ref, atol=3e-2, rtol=3e-2), err
    print("KERNEL_OK")
</pallas_src>

<mosaic_0001>
module attributes {stable_mosaic.version = 11 : i64} {
  func.func @stats_kernel(%arg0: i32, %arg1: i32, %arg2: memref<128x128xbf16, #tpu.memory_space<vmem>>, %arg3: memref<128x128xbf16, #tpu.memory_space<vmem>>, %arg4: memref<8x128xf32, #tpu.memory_space<vmem>>, %arg5: memref<8x128xf32, #tpu.memory_space<vmem>>) attributes {dimension_semantics = [#tpu.dimension_semantics<parallel>, #tpu.dimension_semantics<arbitrary>], iteration_bounds = array<i64: 1, 1>, scalar_prefetch = 0 : i64, scratch_operands = 0 : i64, tpu.core_type = #tpu.core_type<tc>, window_params = [{transform_indices = @transform_0, window_bounds = array<i64: 128, 128>}, {pipeline_mode = #tpu.pipeline_mode<synchronous>, transform_indices = @transform_1, window_bounds = array<i64: 128, 128>}, {transform_indices = @transform_2, window_bounds = array<i64: 8, 128>}, {transform_indices = @transform_3, window_bounds = array<i64: 8, 128>}]} {
    %c0_i32 = arith.constant 0 : i32
    %0 = arith.cmpi eq, %arg1, %c0_i32 : i32
    %1 = arith.extui %0 : i1 to i32
    %c0_i32_0 = arith.constant 0 : i32
    %2 = arith.cmpi ne, %1, %c0_i32_0 : i32
    scf.if %2 {
      %cst_14 = arith.constant 0.000000e+00 : f32
      %16 = vector.broadcast %cst_14 : f32 to vector<8x128xf32>
      %c0_15 = arith.constant 0 : index
      %c0_16 = arith.constant 0 : index
      %17 = vector.load %arg4[%c0_15, %c0_16] : memref<8x128xf32, #tpu.memory_space<vmem>>, vector<8x128xf32>
      tpu.vector_store %arg4[%c0_15, %c0_16], %16 {strides = array<i32>} : memref<8x128xf32, #tpu.memory_space<vmem>>, vector<8x128xf32>,
      %cst_17 = arith.constant 0.000000e+00 : f32
      %18 = vector.broadcast %cst_17 : f32 to vector<8x128xf32>
      %c0_18 = arith.constant 0 : index
      %c0_19 = arith.constant 0 : index
      %19 = vector.load %arg5[%c0_18, %c0_19] : memref<8x128xf32, #tpu.memory_space<vmem>>, vector<8x128xf32>
      tpu.vector_store %arg5[%c0_18, %c0_19], %18 {strides = array<i32>} : memref<8x128xf32, #tpu.memory_space<vmem>>, vector<8x128xf32>,
    } else {
    }
    %c0 = arith.constant 0 : index
    %c0_1 = arith.constant 0 : index
    %3 = vector.load %arg2[%c0, %c0_1] : memref<128x128xbf16, #tpu.memory_space<vmem>>, vector<128x128xbf16>
    %c0_2 = arith.constant 0 : index
    %c0_3 = arith.constant 0 : index
    %4 = vector.load %arg3[%c0_2, %c0_3] : memref<128x128xbf16, #tpu.memory_space<vmem>>, vector<128x128xbf16>
    %cst = arith.constant dense<0.000000e+00> : vector<128x128xf32>
    %5 = tpu.matmul %3, %4, %cst {dimension_numbers = #tpu.dot_dimension_numbers<[1], [0], [0], [1], [0, 0, 1, 1], [], []>} : vector<128x128xbf16>, vector<128x128xbf16>, vector<128x128xf32> -> vector<128x128xf32>
    %6 = vector.shape_cast %5 : vector<128x128xf32> to vector<16x8x128xf32>
    %c0_4 = arith.constant 0 : index
    %c0_5 = arith.constant 0 : index
    %7 = vector.load %arg4[%c0_4, %c0_5] : memref<8x128xf32, #tpu.memory_space<vmem>>, vector<8x128xf32>
    %cst_6 = arith.constant dense<0.000000e+00> : vector<8x128xf32>
    %8 = vector.multi_reduction <add>, %6, %cst_6 [0] : vector<16x8x128xf32> to vector<8x128xf32>
    %9 = arith.addf %7, %8 : vector<8x128xf32>
    %c0_7 = arith.constant 0 : index
    %c0_8 = arith.constant 0 : index
    %10 = vector.load %arg4[%c0_7, %c0_8] : memref<8x128xf32, #tpu.memory_space<vmem>>, vector<8x128xf32>
    tpu.vector_store %arg4[%c0_7, %c0_8], %9 {strides = array<i32>} : memref<8x128xf32, #tpu.memory_space<vmem>>, vector<8x128xf32>,
    %c0_9 = arith.constant 0 : index
    %c0_10 = arith.constant 0 : index
    %11 = vector.load %arg5[%c0_9, %c0_10] : memref<8x128xf32, #tpu.memory_space<vmem>>, vector<8x128xf32>
    %12 = arith.mulf %6, %6 : vector<16x8x128xf32>
    %cst_11 = arith.constant dense<0.000000e+00> : vector<8x128xf32>
    %13 = vector.multi_reduction <add>, %12, %cst_11 [0] : vector<16x8x128xf32> to vector<8x128xf32>
    %14 = arith.addf %11, %13 : vector<8x128xf32>
    %c0_12 = arith.constant 0 : index
    %c0_13 = arith.constant 0 : index
    %15 = vector.load %arg5[%c0_12, %c0_13] : memref<8x128xf32, #tpu.memory_space<vmem>>, vector<8x128xf32>
    tpu.vector_store %arg5[%c0_12, %c0_13], %14 {strides = array<i32>} : memref<8x128xf32, #tpu.memory_space<vmem>>, vector<8x128xf32>,
    return
  }
  func.func @transform_0(%arg0: i32, %arg1: i32) -> (i32, i32) {
    %c1_i32 = arith.constant 1 : i32
    %0 = arith.muli %arg0, %c1_i32 : i32
    %1 = arith.addi %0, %arg1 : i32
    %c0_i32 = arith.constant 0 : i32
    %c0_i32_0 = arith.constant 0 : i32
    return %1, %c0_i32 : i32, i32
  }
  func.func @transform_1(%arg0: i32, %arg1: i32) -> (i32, i32) {
    %c0_i32 = arith.constant 0 : i32
    %c0_i32_0 = arith.constant 0 : i32
    %c0_i32_1 = arith.constant 0 : i32
    return %c0_i32, %c0_i32_0 : i32, i32
  }
  func.func @transform_2(%arg0: i32, %arg1: i32) -> (i32, i32) {
    %c0_i32 = arith.constant 0 : i32
    %c0_i32_0 = arith.constant 0 : i32
    return %arg0, %c0_i32 : i32, i32
  }
  func.func @transform_3(%arg0: i32, %arg1: i32) -> (i32, i32) {
    %c0_i32 = arith.constant 0 : i32
    %c0_i32_0 = arith.constant 0 : i32
    return %arg0, %c0_i32 : i32, i32
  }
}

module attributes {stable_mosaic.version = 11 : i64} {
  func.func @apply_kernel(%arg0: i32, %arg1: memref<128x128xbf16, #tpu.memory_space<vmem>>, %arg2: memref<128x128xbf16, #tpu.memory_space<vmem>>, %arg3: memref<1x128xf32, #tpu.memory_space<vmem>>, %arg4: memref<1x128xf32, #tpu.memory_space<vmem>>, %arg5: memref<128x128xf32, #tpu.memory_space<vmem>>) attributes {dimension_semantics = [#tpu.dimension_semantics<parallel>], iteration_bounds = array<i64: 1>, scalar_prefetch = 0 : i64, scratch_operands = 0 : i64, tpu.core_type = #tpu.core_type<tc>, window_params = [{transform_indices = @transform_0, window_bounds = array<i64: 128, 128>}, {pipeline_mode = #tpu.pipeline_mode<synchronous>, transform_indices = @transform_1, window_bounds = array<i64: 128, 128>}, {pipeline_mode = #tpu.pipeline_mode<synchronous>, transform_indices = @transform_2, window_bounds = array<i64: 1, 128>}, {pipeline_mode = #tpu.pipeline_mode<synchronous>, transform_indices = @transform_3, window_bounds = array<i64: 1, 128>}, {transform_indices = @transform_4, window_bounds = array<i64: 128, 128>}]} {
    %c0 = arith.constant 0 : index
    %c0_0 = arith.constant 0 : index
    %0 = vector.load %arg1[%c0, %c0_0] : memref<128x128xbf16, #tpu.memory_space<vmem>>, vector<128x128xbf16>
    %c0_1 = arith.constant 0 : index
    %c0_2 = arith.constant 0 : index
    %1 = vector.load %arg2[%c0_1, %c0_2] : memref<128x128xbf16, #tpu.memory_space<vmem>>, vector<128x128xbf16>
    %cst = arith.constant dense<0.000000e+00> : vector<128x128xf32>
    %2 = tpu.matmul %0, %1, %cst {dimension_numbers = #tpu.dot_dimension_numbers<[1], [0], [0], [1], [0, 0, 1, 1], [], []>} : vector<128x128xbf16>, vector<128x128xbf16>, vector<128x128xf32> -> vector<128x128xf32>
    %c0_3 = arith.constant 0 : index
    %c0_4 = arith.constant 0 : index
    %3 = vector.load %arg3[%c0_3, %c0_4] : memref<1x128xf32, #tpu.memory_space<vmem>>, vector<1x128xf32>
    %4 = vector.broadcast %3 : vector<1x128xf32> to vector<128x128xf32>
    %5 = arith.mulf %2, %4 : vector<128x128xf32>
    %c0_5 = arith.constant 0 : index
    %c0_6 = arith.constant 0 : index
    %6 = vector.load %arg4[%c0_5, %c0_6] : memref<1x128xf32, #tpu.memory_space<vmem>>, vector<1x128xf32>
    %7 = vector.broadcast %6 : vector<1x128xf32> to vector<128x128xf32>
    %8 = arith.addf %5, %7 : vector<128x128xf32>
    %cst_7 = arith.constant 2.000000e-01 : f32
    %9 = vector.broadcast %cst_7 : f32 to vector<128x128xf32>
    %10 = arith.mulf %9, %8 : vector<128x128xf32>
    %11 = arith.maximumf %8, %10 : vector<128x128xf32>
    %c0_8 = arith.constant 0 : index
    %c0_9 = arith.constant 0 : index
    %12 = vector.load %arg5[%c0_8, %c0_9] : memref<128x128xf32, #tpu.memory_space<vmem>>, vector<128x128xf32>
    tpu.vector_store %arg5[%c0_8, %c0_9], %11 {strides = array<i32>} : memref<128x128xf32, #tpu.memory_space<vmem>>, vector<128x128xf32>,
    return
  }
  func.func @transform_0(%arg0: i32) -> (i32, i32) {
    %c0_i32 = arith.constant 0 : i32
    %c0_i32_0 = arith.constant 0 : i32
    return %arg0, %c0_i32 : i32, i32
  }
  func.func @transform_1(%arg0: i32) -> (i32, i32) {
    %c0_i32 = arith.constant 0 : i32
    %c0_i32_0 = arith.constant 0 : i32
    %c0_i32_1 = arith.constant 0 : i32
    return %c0_i32, %c0_i32_0 : i32, i32
  }
  func.func @transform_2(%arg0: i32) -> (i32, i32) {
    %c0_i32 = arith.constant 0 : i32
    %c0_i32_0 = arith.constant 0 : i32
    %c0_i32_1 = arith.constant 0 : i32
    return %c0_i32, %c0_i32_0 : i32, i32
  }
  func.func @transform_3(%arg0: i32) -> (i32, i32) {
    %c0_i32 = arith.constant 0 : i32
    %c0_i32_0 = arith.constant 0 : i32
    %c0_i32_1 = arith.constant 0 : i32
    return %c0_i32, %c0_i32_0 : i32, i32
  }
  func.func @transform_4(%arg0: i32) -> (i32, i32) {
    %c0_i32 = arith.constant 0 : i32
    %c0_i32_0 = arith.constant 0 : i32
    return %arg0, %c0_i32 : i32, i32
  }
}

</mosaic_0001>

<bundles_post_ra>
// kernel: cnn_block_forward.2
= control target key start
LH: loop header
LB: loop body
LE: loop exit
PB: predicated region body
PF: predicated region fallthrough
CT: control target
= control target key end

     0   :  { %s463_s1 = inlined_call_operand.vmem [shape: bf16[128,128], index: 1, kind: input, shape index: {}]   ;;  %s464_s0 = inlined_call_operand.vmem [shape: bf16[128,128], index: 0, kind: input, shape index: {}]   ;;  %s465_s2 = inlined_call_operand.vmem [shape: f32[8,128], index: 2, kind: output, shape index: {0}]   ;;  %s466_s3 = inlined_call_operand.vmem [shape: f32[8,128], index: 3, kind: output, shape index: {1}]  }
   0x1   :  { %v363_v0 = vld [vmem:[%s463_s1 + $0x38] sm:$0xff]  ;;  %v362_v1 = vld [vmem:[%s463_s1 + $0x30] sm:$0xff]  ;;  %v361_v2 = vld [vmem:[%s463_s1 + $0x28] sm:$0xff] }
   0x2   :  { %169 = vmatpush.bf16.msra.mxu0 %v363_v0  ;;  %364 = vmatpush.bf16.msra.mxu1 %v363_v0  ;;  %v360_v3 = vld [vmem:[%s463_s1 + $0x20] sm:$0xff]  ;;  %v359_v4 = vld [vmem:[%s463_s1 + $0x18] sm:$0xff]  ;;  %v358_v5 = vld [vmem:[%s463_s1 + $0x10] sm:$0xff] }
   0x3   :  { %365 = vmatpush.bf16.msra.mxu2 %v363_v0  ;;  %366 = vmatpush.bf16.msra.mxu3 %v363_v0  ;;  %v357_v6 = vld [vmem:[%s463_s1 + $0x8] sm:$0xff]  ;;  %v356_v7 = vld [vmem:[%s463_s1] sm:$0xff]  ;;  %v350_v9 = vld [vmem:[%s464_s0 + $0x10] sm:$0xff] }
   0x4   :  { %v348_v8 = vld [vmem:[%s464_s0] sm:$0xff]  ;;  %v354_v11 = vld [vmem:[%s464_s0 + $0x30] sm:$0xff]  ;;  %v349_v12 = vld [vmem:[%s464_s0 + $0x8] sm:$0xff] }
   0x5   :  { %v352_v10 = vld [vmem:[%s464_s0 + $0x20] sm:$0xff]  ;;  %v351_v13 = vld [vmem:[%s464_s0 + $0x18] sm:$0xff]  ;;  %v353_v14 = vld [vmem:[%s464_s0 + $0x28] sm:$0xff] }
   0x6   :  { %170 = vmatpush.bf16.msra.mxu0 %v362_v1  ;;  %367 = vmatpush.bf16.msra.mxu1 %v362_v1  ;;  %v355_v15 = vld [vmem:[%s464_s0 + $0x38] sm:$0xff] }
   0x7   :  { %368 = vmatpush.bf16.msra.mxu2 %v362_v1  ;;  %369 = vmatpush.bf16.msra.mxu3 %v362_v1 }
   0xa   :  { %171 = vmatpush.bf16.msra.mxu0 %v361_v2  ;;  %370 = vmatpush.bf16.msra.mxu1 %v361_v2 }
   0xb   :  { %371 = vmatpush.bf16.msra.mxu2 %v361_v2  ;;  %372 = vmatpush.bf16.msra.mxu3 %v361_v2 }
   0xe   :  { %172 = vmatpush.bf16.msra.mxu0 %v360_v3  ;;  %373 = vmatpush.bf16.msra.mxu1 %v360_v3 }
   0xf   :  { %374 = vmatpush.bf16.msra.mxu2 %v360_v3  ;;  %375 = vmatpush.bf16.msra.mxu3 %v360_v3 }
  0x12   :  { %173 = vmatpush.bf16.msra.mxu0 %v359_v4  ;;  %376 = vmatpush.bf16.msra.mxu1 %v359_v4 }
  0x13   :  { %377 = vmatpush.bf16.msra.mxu2 %v359_v4  ;;  %378 = vmatpush.bf16.msra.mxu3 %v359_v4 }
  0x16   :  { %174 = vmatpush.bf16.msra.mxu0 %v358_v5  ;;  %379 = vmatpush.bf16.msra.mxu1 %v358_v5 }
  0x17   :  { %380 = vmatpush.bf16.msra.mxu2 %v358_v5  ;;  %381 = vmatpush.bf16.msra.mxu3 %v358_v5 }
  0x1a   :  { %175 = vmatpush.bf16.msra.mxu0 %v357_v6  ;;  %382 = vmatpush.bf16.msra.mxu1 %v357_v6 }
  0x1b   :  { %383 = vmatpush.bf16.msra.mxu2 %v357_v6  ;;  %384 = vmatpush.bf16.msra.mxu3 %v357_v6 }
  0x1e   :  { %176 = vmatpush.bf16.msra.mxu0 %v356_v7  ;;  %385 = vmatpush.bf16.msra.mxu1 %v356_v7 }
  0x1f   :  { %386 = vmatpush.bf16.msra.mxu2 %v356_v7  ;;  %387 = vmatpush.bf16.msra.mxu3 %v356_v7 }
  0x21   :  { %177 = vmatmul.bf16.vlgmr.msra.gmra.mxu0 %v348_v8  ;;  %187 = vmatmul.bf16.vlgmr.msra.gmra.mxu1 %v350_v9 }
  0x22   :  { %197 = vmatmul.bf16.vlgmr.msra.gmra.mxu2 %v352_v10  ;;  %207 = vmatmul.bf16.vlgmr.msra.gmra.mxu3 %v354_v11 }
  0x31   :  { %182 = vmatmul.bf16.gmra.mxu0 %v349_v12  ;;  %192 = vmatmul.bf16.gmra.mxu1 %v351_v13 }
  0x32   :  { %202 = vmatmul.bf16.gmra.mxu2 %v353_v14  ;;  %212 = vmatmul.bf16.gmra.mxu3 %v355_v15 }
  0x9e   :  { %v178_v16 = vpop.f32.mrf.mxu0  ;;  %v188_v17 = vpop.f32.mrf.mxu1 }
  0x9f   :  { %v237_v26 = vmul.f32 %v178_v16, %v178_v16  ;;  %v241_v36 = vmul.f32 %v188_v17, %v188_v17 }
  0xa5   :  { %v198_v19 = vpop.f32.mrf.mxu2  ;;  %v208_v22 = vpop.f32.mrf.mxu3 }
  0xa6   :  { %v180_v18 = vpop.f32.mrf.mxu0  ;;  %v190_v20 = vpop.f32.mrf.mxu1  ;;  %v245_v50 = vmul.f32 %v198_v19, %v198_v19  ;;  %v249_v0 = vmul.f32 %v208_v22, %v208_v22 }
  0xa7   :  { %v238_v24 = vmul.f32 %v180_v18, %v180_v18  ;;  %v219_v27 = vadd.f32 %v180_v18, %v178_v16  ;;  %v242_v40 = vmul.f32 %v190_v20, %v190_v20 }
  0xa9   :  { %v253_v29 = vadd.f32 %v238_v24, %v237_v26 }
  0xad   :  { %v200_v23 = vpop.f32.mrf.mxu2  ;;  %v210_v35 = vpop.f32.mrf.mxu3 }
  0xae   :  { %v183_v21 = vpop.f32.mrf.mxu0  ;;  %v193_v25 = vpop.f32.mrf.mxu1  ;;  %v246_v54 = vmul.f32 %v200_v23, %v200_v23  ;;  %v250_v3 = vmul.f32 %v210_v35, %v210_v35 }
  0xaf   :  { %v239_v28 = vmul.f32 %v183_v21, %v183_v21  ;;  %v220_v30 = vadd.f32 %v219_v27, %v183_v21  ;;  %v243_v44 = vmul.f32 %v193_v25, %v193_v25 }
  0xb1   :  { %v254_v32 = vadd.f32 %v253_v29, %v239_v28 }
  0xb5   :  { %v203_v39 = vpop.f32.mrf.mxu2  ;;  %v213_v53 = vpop.f32.mrf.mxu3 }
  0xb6   :  { %v185_v31 = vpop.f32.mrf.mxu0  ;;  %v195_v43 = vpop.f32.mrf.mxu1  ;;  %v247_v59 = vmul.f32 %v203_v39, %v203_v39  ;;  %v251_v8 = vmul.f32 %v213_v53, %v213_v53 }
  0xb7   :  { %v221_v33 = vadd.f32 %v220_v30, %v185_v31  ;;  %v240_v34 = vmul.f32 %v185_v31, %v185_v31  ;;  %v244_v48 = vmul.f32 %v195_v43, %v195_v43 }
  0xb9   :  { %v222_v37 = vadd.f32 %v221_v33, %v188_v17  ;;  %v255_v38 = vadd.f32 %v254_v32, %v240_v34 }
  0xbb   :  { %v256_v41 = vadd.f32 %v255_v38, %v241_v36  ;;  %v223_v42 = vadd.f32 %v222_v37, %v190_v20 }
  0xbd   :  { %v224_v45 = vadd.f32 %v223_v42, %v193_v25  ;;  %v257_v46 = vadd.f32 %v256_v41, %v242_v40  ;;  %v205_v57 = vpop.f32.mrf.mxu2  ;;  %v215_v6 = vpop.f32.mrf.mxu3 }
  0xbe   :  { %v248_v63 = vmul.f32 %v205_v57, %v205_v57  ;;  %v252_v12 = vmul.f32 %v215_v6, %v215_v6 }
  0xbf   :  { %v225_v47 = vadd.f32 %v224_v45, %v195_v43  ;;  %v258_v49 = vadd.f32 %v257_v46, %v243_v44 }
  0xc1   :  { %v226_v51 = vadd.f32 %v225_v47, %v198_v19  ;;  %v259_v52 = vadd.f32 %v258_v49, %v244_v48 }
  0xc3   :  { %v260_v55 = vadd.f32 %v259_v52, %v245_v50  ;;  %v227_v56 = vadd.f32 %v226_v51, %v200_v23 }
  0xc5   :  { %v228_v58 = vadd.f32 %v227_v56, %v203_v39  ;;  %v261_v60 = vadd.f32 %v260_v55, %v246_v54 }
  0xc7   :  { %v262_v61 = vadd.f32 %v261_v60, %v247_v59  ;;  %v229_v62 = vadd.f32 %v228_v58, %v205_v57 }
  0xc9   :  { %v230_v1 = vadd.f32 %v229_v62, %v208_v22  ;;  %v263_v2 = vadd.f32 %v262_v61, %v248_v63 }
  0xcb   :  { %v264_v4 = vadd.f32 %v263_v2, %v249_v0  ;;  %v231_v5 = vadd.f32 %v230_v1, %v210_v35 }
  0xcd   :  { %v232_v7 = vadd.f32 %v231_v5, %v213_v53  ;;  %v265_v9 = vadd.f32 %v264_v4, %v250_v3 }
  0xcf   :  { %v266_v10 = vadd.f32 %v265_v9, %v251_v8  ;;  %v233_v11 = vadd.f32 %v232_v7, %v215_v6 }
  0xd1   :  { %v267_v13 = vadd.f32 %v266_v10, %v252_v12  ;;  %235 = vst [vmem:[%s465_s2] sm:$0xff] %v233_v11 }
  0xd3   :  { %269 = vst [vmem:[%s466_s3] sm:$0xff] %v267_v13 }

// kernel: cnn_block_forward.3
= control target key start
LH: loop header
LB: loop body
LE: loop exit
PB: predicated region body
PF: predicated region fallthrough
CT: control target
= control target key end

     0   :  { %s555_s1 = inlined_call_operand.vmem [shape: bf16[128,128], index: 1, kind: input, shape index: {}]   ;;  %s556_s2 = inlined_call_operand.vmem [shape: f32[1,128], index: 2, kind: input, shape index: {}]   ;;  %s557_s3 = inlined_call_operand.vmem [shape: f32[1,128], index: 3, kind: input, shape index: {}]   ;;  %s558_s0 = inlined_call_operand.vmem [shape: bf16[128,128], index: 0, kind: input, shape index: {}]   ;;  %s559_s4 = inlined_call_operand.vmem [shape: f32[128,128], index: 4, kind: output, shape index: {}]  }
   0x1   :  { %v365_v0 = vld [vmem:[%s555_s1 + $0x38] sm:$0xff]  ;;  %v364_v1 = vld [vmem:[%s555_s1 + $0x30] sm:$0xff]  ;;  %v363_v2 = vld [vmem:[%s555_s1 + $0x28] sm:$0xff] }
   0x2   :  { %145 = vmatpush.bf16.msra.mxu0 %v365_v0  ;;  %366 = vmatpush.bf16.msra.mxu1 %v365_v0  ;;  %v362_v3 = vld [vmem:[%s555_s1 + $0x20] sm:$0xff]  ;;  %v361_v4 = vld [vmem:[%s555_s1 + $0x18] sm:$0xff]  ;;  %v360_v5 = vld [vmem:[%s555_s1 + $0x10] sm:$0xff] }
   0x3   :  { %367 = vmatpush.bf16.msra.mxu2 %v365_v0  ;;  %368 = vmatpush.bf16.msra.mxu3 %v365_v0  ;;  %v359_v6 = vld [vmem:[%s555_s1 + $0x8] sm:$0xff]  ;;  %v358_v7 = vld [vmem:[%s555_s1] sm:$0xff]  ;;  %v352_v9 = vld [vmem:[%s558_s0 + $0x10] sm:$0xff] }
   0x4   :  { %v350_v8 = vld [vmem:[%s558_s0] sm:$0xff]  ;;  %v356_v11 = vld [vmem:[%s558_s0 + $0x30] sm:$0xff]  ;;  %v351_v12 = vld [vmem:[%s558_s0 + $0x8] sm:$0xff] }
   0x5   :  { %v354_v10 = vld [vmem:[%s558_s0 + $0x20] sm:$0xff]  ;;  %v353_v13 = vld [vmem:[%s558_s0 + $0x18] sm:$0xff]  ;;  %v355_v14 = vld [vmem:[%s558_s0 + $0x28] sm:$0xff] }
   0x6   :  { %146 = vmatpush.bf16.msra.mxu0 %v364_v1  ;;  %369 = vmatpush.bf16.msra.mxu1 %v364_v1  ;;  %v357_v15 = vld [vmem:[%s558_s0 + $0x38] sm:$0xff]  ;;  %v468_v16 = vld [vmem:[%s556_s2] ss:$0 sm:$0xff] }
   0x7   :  { %370 = vmatpush.bf16.msra.mxu2 %v364_v1  ;;  %371 = vmatpush.bf16.msra.mxu3 %v364_v1  ;;  %v473_v17 = vld [vmem:[%s557_s3] ss:$0 sm:$0xff] }
   0xa   :  { %147 = vmatpush.bf16.msra.mxu0 %v363_v2  ;;  %372 = vmatpush.bf16.msra.mxu1 %v363_v2 }
   0xb   :  { %373 = vmatpush.bf16.msra.mxu2 %v363_v2  ;;  %374 = vmatpush.bf16.msra.mxu3 %v363_v2 }
   0xe   :  { %148 = vmatpush.bf16.msra.mxu0 %v362_v3  ;;  %375 = vmatpush.bf16.msra.mxu1 %v362_v3 }
   0xf   :  { %376 = vmatpush.bf16.msra.mxu2 %v362_v3  ;;  %377 = vmatpush.bf16.msra.mxu3 %v362_v3 }
  0x12   :  { %149 = vmatpush.bf16.msra.mxu0 %v361_v4  ;;  %378 = vmatpush.bf16.msra.mxu1 %v361_v4 }
  0x13   :  { %379 = vmatpush.bf16.msra.mxu2 %v361_v4  ;;  %380 = vmatpush.bf16.msra.mxu3 %v361_v4 }
  0x16   :  { %150 = vmatpush.bf16.msra.mxu0 %v360_v5  ;;  %381 = vmatpush.bf16.msra.mxu1 %v360_v5 }
  0x17   :  { %382 = vmatpush.bf16.msra.mxu2 %v360_v5  ;;  %383 = vmatpush.bf16.msra.mxu3 %v360_v5 }
  0x1a   :  { %151 = vmatpush.bf16.msra.mxu0 %v359_v6  ;;  %384 = vmatpush.bf16.msra.mxu1 %v359_v6 }
  0x1b   :  { %385 = vmatpush.bf16.msra.mxu2 %v359_v6  ;;  %386 = vmatpush.bf16.msra.mxu3 %v359_v6 }
  0x1e   :  { %152 = vmatpush.bf16.msra.mxu0 %v358_v7  ;;  %387 = vmatpush.bf16.msra.mxu1 %v358_v7 }
  0x1f   :  { %388 = vmatpush.bf16.msra.mxu2 %v358_v7  ;;  %389 = vmatpush.bf16.msra.mxu3 %v358_v7 }
  0x21   :  { %153 = vmatmul.bf16.vlgmr.msra.gmra.mxu0 %v350_v8  ;;  %163 = vmatmul.bf16.vlgmr.msra.gmra.mxu1 %v352_v9 }
  0x22   :  { %173 = vmatmul.bf16.vlgmr.msra.gmra.mxu2 %v354_v10  ;;  %183 = vmatmul.bf16.vlgmr.msra.gmra.mxu3 %v356_v11 }
  0x31   :  { %158 = vmatmul.bf16.gmra.mxu0 %v351_v12  ;;  %168 = vmatmul.bf16.gmra.mxu1 %v353_v13 }
  0x32   :  { %178 = vmatmul.bf16.gmra.mxu2 %v355_v14  ;;  %188 = vmatmul.bf16.gmra.mxu3 %v357_v15 }
  0x9e   :  { %v154_v18 = vpop.f32.mrf.mxu0  ;;  %v164_v19 = vpop.f32.mrf.mxu1 }
  0x9f   :  { %v198_v20 = vmul.f32 %v468_v16, %v154_v18  ;;  %v202_v21 = vmul.f32 %v468_v16, %v164_v19 }
  0xa1   :  { %v218_v22 = vadd.f32 %v473_v17, %v198_v20  ;;  %v222_v23 = vadd.f32 %v473_v17, %v202_v21 }
  0xa3   :  { %v234_v24 = vmul.f32 0.2, %v218_v22  ;;  %v238_v25 = vmul.f32 0.2, %v222_v23 }
  0xa5   :  { %v250_v26 = vmax.f32 %v218_v22, %v234_v24  ;;  %v254_v27 = vmax.f32 %v222_v23, %v238_v25  ;;  %v174_v28 = vpop.f32.mrf.mxu2  ;;  %v184_v29 = vpop.f32.mrf.mxu3 }
  0xa6   :  { %v206_v30 = vmul.f32 %v468_v16, %v174_v28  ;;  %v210_v31 = vmul.f32 %v468_v16, %v184_v29  ;;  %v156_v32 = vpop.f32.mrf.mxu0  ;;  %v166_v33 = vpop.f32.mrf.mxu1 }
  0xa7   :  { %266 = vst [vmem:[%s559_s4] sm:$0xff] %v250_v26  ;;  %v199_v34 = vmul.f32 %v468_v16, %v156_v32  ;;  %v203_v35 = vmul.f32 %v468_v16, %v166_v33 }
  0xa8   :  { %270 = vst [vmem:[%s559_s4 + $0x20] sm:$0xff] %v254_v27  ;;  %v226_v36 = vadd.f32 %v473_v17, %v206_v30  ;;  %v230_v37 = vadd.f32 %v473_v17, %v210_v31 }
  0xa9   :  { %v219_v38 = vadd.f32 %v473_v17, %v199_v34  ;;  %v223_v39 = vadd.f32 %v473_v17, %v203_v35 }
  0xaa   :  { %v242_v40 = vmul.f32 0.2, %v226_v36  ;;  %v246_v41 = vmul.f32 0.2, %v230_v37 }
  0xab   :  { %v235_v42 = vmul.f32 0.2, %v219_v38  ;;  %v239_v43 = vmul.f32 0.2, %v223_v39 }
  0xac   :  { %v258_v44 = vmax.f32 %v226_v36, %v242_v40  ;;  %v262_v45 = vmax.f32 %v230_v37, %v246_v41 }
  0xad   :  { %v251_v46 = vmax.f32 %v219_v38, %v235_v42  ;;  %v255_v47 = vmax.f32 %v223_v39, %v239_v43  ;;  %v176_v48 = vpop.f32.mrf.mxu2  ;;  %v186_v49 = vpop.f32.mrf.mxu3 }
  0xae   :  { %274 = vst [vmem:[%s559_s4 + $0x40] sm:$0xff] %v258_v44  ;;  %v207_v50 = vmul.f32 %v468_v16, %v176_v48  ;;  %v211_v51 = vmul.f32 %v468_v16, %v186_v49  ;;  %v159_v52 = vpop.f32.mrf.mxu0  ;;  %v169_v53 = vpop.f32.mrf.mxu1 }
  0xaf   :  { %278 = vst [vmem:[%s559_s4 + $0x60] sm:$0xff] %v262_v45  ;;  %v200_v54 = vmul.f32 %v468_v16, %v159_v52  ;;  %v204_v55 = vmul.f32 %v468_v16, %v169_v53 }
  0xb0   :  { %267 = vst [vmem:[%s559_s4 + $0x8] sm:$0xff] %v251_v46  ;;  %v227_v56 = vadd.f32 %v473_v17, %v207_v50  ;;  %v231_v57 = vadd.f32 %v473_v17, %v211_v51 }
  0xb1   :  { %271 = vst [vmem:[%s559_s4 + $0x28] sm:$0xff] %v255_v47  ;;  %v220_v58 = vadd.f32 %v473_v17, %v200_v54  ;;  %v224_v59 = vadd.f32 %v473_v17, %v204_v55 }
  0xb2   :  { %v243_v60 = vmul.f32 0.2, %v227_v56  ;;  %v247_v61 = vmul.f32 0.2, %v231_v57 }
  0xb3   :  { %v236_v62 = vmul.f32 0.2, %v220_v58  ;;  %v240_v63 = vmul.f32 0.2, %v224_v59 }
  0xb4   :  { %v259_v0 = vmax.f32 %v227_v56, %v243_v60  ;;  %v263_v1 = vmax.f32 %v231_v57, %v247_v61 }
  0xb5   :  { %v252_v2 = vmax.f32 %v220_v58, %v236_v62  ;;  %v256_v3 = vmax.f32 %v224_v59, %v240_v63  ;;  %v179_v4 = vpop.f32.mrf.mxu2  ;;  %v189_v5 = vpop.f32.mrf.mxu3 }
  0xb6   :  { %275 = vst [vmem:[%s559_s4 + $0x48] sm:$0xff] %v259_v0  ;;  %v208_v6 = vmul.f32 %v468_v16, %v179_v4  ;;  %v212_v7 = vmul.f32 %v468_v16, %v189_v5  ;;  %v161_v8 = vpop.f32.mrf.mxu0  ;;  %v171_v9 = vpop.f32.mrf.mxu1 }
  0xb7   :  { %279 = vst [vmem:[%s559_s4 + $0x68] sm:$0xff] %v263_v1  ;;  %v201_v10 = vmul.f32 %v468_v16, %v161_v8  ;;  %v205_v11 = vmul.f32 %v468_v16, %v171_v9 }
  0xb8   :  { %268 = vst [vmem:[%s559_s4 + $0x10] sm:$0xff] %v252_v2  ;;  %v228_v12 = vadd.f32 %v473_v17, %v208_v6  ;;  %v232_v13 = vadd.f32 %v473_v17, %v212_v7 }
  0xb9   :  { %272 = vst [vmem:[%s559_s4 + $0x30] sm:$0xff] %v256_v3  ;;  %v221_v14 = vadd.f32 %v473_v17, %v201_v10  ;;  %v225_v15 = vadd.f32 %v473_v17, %v205_v11 }
  0xba   :  { %v244_v18 = vmul.f32 0.2, %v228_v12  ;;  %v248_v19 = vmul.f32 0.2, %v232_v13 }
  0xbb   :  { %v237_v20 = vmul.f32 0.2, %v221_v14  ;;  %v241_v21 = vmul.f32 0.2, %v225_v15 }
  0xbc   :  { %v260_v22 = vmax.f32 %v228_v12, %v244_v18  ;;  %v264_v23 = vmax.f32 %v232_v13, %v248_v19 }
  0xbd   :  { %v253_v24 = vmax.f32 %v221_v14, %v237_v20  ;;  %v257_v25 = vmax.f32 %v225_v15, %v241_v21  ;;  %v181_v26 = vpop.f32.mrf.mxu2  ;;  %v191_v27 = vpop.f32.mrf.mxu3 }
  0xbe   :  { %276 = vst [vmem:[%s559_s4 + $0x50] sm:$0xff] %v260_v22  ;;  %v209_v28 = vmul.f32 %v468_v16, %v181_v26  ;;  %v213_v29 = vmul.f32 %v468_v16, %v191_v27 }
  0xbf   :  { %280 = vst [vmem:[%s559_s4 + $0x70] sm:$0xff] %v264_v23 }
  0xc0   :  { %269 = vst [vmem:[%s559_s4 + $0x18] sm:$0xff] %v253_v24  ;;  %v229_v30 = vadd.f32 %v473_v17, %v209_v28  ;;  %v233_v31 = vadd.f32 %v473_v17, %v213_v29 }
  0xc1   :  { %273 = vst [vmem:[%s559_s4 + $0x38] sm:$0xff] %v257_v25 }
  0xc2   :  { %v245_v32 = vmul.f32 0.2, %v229_v30  ;;  %v249_v33 = vmul.f32 0.2, %v233_v31 }
  0xc4   :  { %v261_v34 = vmax.f32 %v229_v30, %v245_v32  ;;  %v265_v16 = vmax.f32 %v233_v31, %v249_v33 }
  0xc6   :  { %277 = vst [vmem:[%s559_s4 + $0x58] sm:$0xff] %v261_v34 }
  0xc7   :  { %281 = vst [vmem:[%s559_s4 + $0x78] sm:$0xff] %v265_v16 }

</bundles_post_ra>
